<compile_context>
chip_gen: v6e
topology: v6e:2x2x1
jax: 0.10.0
libtpu: 0.0.40
codegen_flags: <defaults>
</compile_context>

<pallas_src>
import math

import jax
import jax.numpy as jnp
from jax.experimental import pallas as pl
from jax.experimental.pallas import tpu as pltpu

NORM_EPS = 1e-6
_MIB = 1024 * 1024


# ----------------------------------------------------------------------------
# Hardware-aware helpers
# ----------------------------------------------------------------------------
def _physical_vmem_bytes():
    """Physical VMEM per TensorCore; conservative 64 MiB (v7x) fallback."""
    try:
        info = pltpu.get_tpu_info()
        cap = getattr(info, "vmem_capacity_bytes", None)
        if cap:
            return int(cap)
    except Exception:
        pass
    return 64 * _MIB


def _default_tl():
    """Per-generation L-tile default.

    v5e's roofline corner (~240 flop/B) is already reached around TL=256-512
    and its MXU is 128-wide, so oversizing only adds f32 vreg/spill pressure.
    v6e/v7x need TL~1024 (~620-680 flop/B corner) to keep the head matmul
    MXU-bound on the streamed weight."""
    try:
        kind = jax.devices()[0].device_kind.lower()
    except Exception:
        return 1024
    if "v5 lite" in kind or "v5e" in kind or "v5lite" in kind:
        return 512
    return 1024


def _head_vmem_bytes(TL, TV, C, out_bytes, wbuf=2):
    """Per-step working set of the head kernel (double-buffered blocks)."""
    return (2 * TL * C * 4              # h block (f32)
            + wbuf * C * TV * 2         # head weight block (bf16)
            + 2 * TV * 4                # bias block (f32)
            + 4 * C * 4                 # scale + shift blocks (f32, tiny)
            + 2 * TL * TV * out_bytes   # logits block
            + TL * C * 2)               # persistent x scratch (bf16)


def _fit_head_tiles(L, C, V, tl_pref, tv_pref, out_bytes, wbuf, budget):
    """Pick (TL, TV): multiples of (8, 128) (or full extents) that fit
    `budget` bytes. Shrink TV first — weight reuse scales with TL, TV only
    sets the weight/output block footprint."""
    TL = L if L <= tl_pref else max(8, (tl_pref // 8) * 8)
    TV = V if V <= tv_pref else max(128, (tv_pref // 128) * 128)

    def shrink(t, align):
        nt = (t // 2 // align) * align
        return nt if nt >= align else t

    while _head_vmem_bytes(TL, TV, C, out_bytes, wbuf) > budget:
        if TV >= 256:
            TV = shrink(TV, 128)
        elif TL >= 16:
            TL = shrink(TL, 8)
        else:
            break
    return TL, TV


# ----------------------------------------------------------------------------
# Kernel 1: get_logits = head( AdaLNBeforeHead(h, cond_BD) )
# ----------------------------------------------------------------------------
def _head_kernel(h_ref, scale_ref, shift_ref, w_ref, b_ref, out_ref, x_ref):
    # h_ref:     (1, TL, C)   f32      scale_ref/shift_ref: (1, 1, C) f32
    # w_ref:     (C, TV)      bf16     b_ref:  (1, TV) f32
    # out_ref:   (1, TL, TV)  out_dtype
    # x_ref:     (TL, C)      bf16 VMEM scratch
    #
    # LN + adaLN modulation is computed once per (batch, L-tile) in f32 and
    # reused for every V tile (V is the innermost, "arbitrary" grid axis).
    @pl.when(pl.program_id(2) == 0)
    def _():
        h = h_ref[0]                                     # f32 (TL, C)
        mean = jnp.mean(h, axis=-1, keepdims=True)
        cen = h - mean
        var = jnp.mean(cen * cen, axis=-1, keepdims=True)
        ln = cen * jax.lax.rsqrt(var + NORM_EPS)
        x = ln * scale_ref[0] + shift_ref[0]             # scale already has +1
        x_ref[...] = x.astype(x_ref.dtype)

    # bf16 x bf16 -> f32 accumulation on the MXU.
    acc = jnp.dot(x_ref[...], w_ref[...], preferred_element_type=jnp.float32)
    out_ref[0] = (acc + b_ref[...]).astype(out_ref.dtype)


def get_logits(h_BLC, cond_BD, params, *, tl=None, tv=512,
               out_dtype=jnp.float32, weight_buffers=2,
               vmem_limit_bytes=None):
    """h_BLC: (B, L, C), cond_BD: (B, D)  ->  logits (B, L, V) in `out_dtype`.

    out_dtype defaults to float32 (module does `.float()`); pass bf16 to
    halve logits writeback when the consumer tolerates it."""
    B, L, C = h_BLC.shape
    w_head = params["head_w"]
    V = w_head.shape[1]

    # adaLN scale/shift hoisted out of the kernel: one batched (B, D)x(D, 2C)
    # matmul instead of an M=1 matmul repeated every grid step. Fold the +1.
    cond = cond_BD.astype(jnp.float32)
    silu = cond * jax.nn.sigmoid(cond)
    ada = silu @ params["ada_w"].astype(jnp.float32) + params["ada_b"]
    scale = (ada[:, :C] + 1.0).reshape(B, 1, C).astype(jnp.float32)
    shift = ada[:, C:].reshape(B, 1, C).astype(jnp.float32)

    if tl is None:
        tl = _default_tl()
    out_bytes = jnp.dtype(out_dtype).itemsize
    phys = _physical_vmem_bytes()
    budget = (vmem_limit_bytes if vmem_limit_bytes is not None
              else int(phys * 0.75))
    TL, TV = _fit_head_tiles(L, C, V, tl, tv, out_bytes, max(2, weight_buffers),
                             budget)
    if vmem_limit_bytes is None:
        vmem_limit_bytes = int(min(max(budget, 32 * _MIB), 100 * _MIB))

    n_l = (L + TL - 1) // TL
    n_v = (V + TV - 1) // TV
    grid = (B, n_l, n_v)

    h_f32 = h_BLC.astype(jnp.float32)         # LN statistics in f32 (module fidelity)
    w_bf16 = w_head.astype(jnp.bfloat16)
    b_head = params["head_b"].astype(jnp.float32).reshape(1, V)

    # Optional deeper weight pipeline (v5e, if the per-step weight DMA is
    # still exposed). Default (2) keeps standard double-buffering.
    w_kwargs = {}
    if weight_buffers and weight_buffers != 2:
        w_kwargs["pipeline_mode"] = pl.Buffered(weight_buffers)
    w_spec = pl.BlockSpec((C, TV), lambda b, i, j: (0, j), **w_kwargs)

    cost = pl.CostEstimate(
        flops=2 * B * L * C * V,
        transcendentals=0,
        bytes_accessed=(B * L * C * 4                 # h read once (f32)
                        + B * n_l * C * V * 2         # head weight re-streamed per (b, L-tile)
                        + B * L * V * out_bytes       # logits writeback
                        + 2 * B * C * 4 + V * 4),     # scale/shift + bias
    )

    return pl.pallas_call(
        _head_kernel,
        out_shape=jax.ShapeDtypeStruct((B, L, V), out_dtype),
        grid_spec=pltpu.PrefetchScalarGridSpec(
            num_scalar_prefetch=0,
            grid=grid,
            in_specs=[
                pl.BlockSpec((1, TL, C), lambda b, i, j: (b, i, 0)),
                pl.BlockSpec((1, 1, C), lambda b, i, j: (b, 0, 0)),
                pl.BlockSpec((1, 1, C), lambda b, i, j: (b, 0, 0)),
                w_spec,
                pl.BlockSpec((1, TV), lambda b, i, j: (0, j)),
            ],
            out_specs=pl.BlockSpec((1, TL, TV), lambda b, i, j: (b, i, j)),
            scratch_shapes=[pltpu.VMEM((TL, C), jnp.bfloat16)],
        ),
        compiler_params=pltpu.CompilerParams(
            dimension_semantics=("parallel", "parallel", "arbitrary"),
            vmem_limit_bytes=vmem_limit_bytes),
        cost_estimate=cost,
    )(h_f32, scale, shift, w_bf16, b_head)


# ----------------------------------------------------------------------------
# Kernel 2: SharedAdaLin.forward  (Linear(D, 6C) then view(-1, 1, 6, C))
# B folded into the matmul M dimension; single column tile by default.
# ----------------------------------------------------------------------------
def _shared_ada_lin_kernel(cond_ref, w_ref, b_ref, out_ref):
    # cond: (B, D) bf16, w: (D, TN) bf16, b: (1, TN) f32, out: (B, TN)
    out_ref[...] = (jnp.dot(cond_ref[...], w_ref[...],
                            preferred_element_type=jnp.float32)
                    + b_ref[...]).astype(out_ref.dtype)


def shared_ada_lin(cond_BD, w_D_6C, b_6C, *, tn=6144, out_dtype=jnp.float32):
    B, D = cond_BD.shape
    sixC = w_D_6C.shape[1]
    C = sixC // 6
    TN = sixC if sixC <= tn else max(128, (tn // 128) * 128)
    grid_n = (sixC + TN - 1) // TN
    out = pl.pallas_call(
        _shared_ada_lin_kernel,
        out_shape=jax.ShapeDtypeStruct((B, sixC), out_dtype),
        grid_spec=pltpu.PrefetchScalarGridSpec(
            num_scalar_prefetch=0,
            grid=(grid_n,),
            in_specs=[
                pl.BlockSpec((B, D), lambda j: (0, 0)),
                pl.BlockSpec((D, TN), lambda j: (0, j)),
                pl.BlockSpec((1, TN), lambda j: (0, j)),
            ],
            out_specs=pl.BlockSpec((B, TN), lambda j: (0, j)),
        ),
        compiler_params=pltpu.CompilerParams(
            dimension_semantics=("parallel",)),
    )(cond_BD.astype(jnp.bfloat16), w_D_6C.astype(jnp.bfloat16),
      b_6C.reshape(1, sixC).astype(jnp.float32))
    return out.reshape(B, 1, 6, C)


# ----------------------------------------------------------------------------
# Parameter / buffer construction (deterministic, mirrors __init__ shapes)
# ----------------------------------------------------------------------------
def build_transformer_params(key, *, num_classes, C, D, V, patch_nums):
    ks = jax.random.split(key, 8)
    init_std = math.sqrt(1.0 / C / 3.0)

    def trunc(k, shape, std):
        return (std * jax.random.truncated_normal(k, -2.0, 2.0, shape)
                ).astype(jnp.float32)

    params = {
        # class_emb: Embedding(num_classes + 1, C)
        "class_emb": trunc(ks[0], (num_classes + 1, C), init_std),
        # head_nm.ada_lin[-1]: Linear(D, 2C)  (stored transposed: (D, 2C))
        "ada_w": trunc(ks[1], (D, 2 * C), 0.02),
        "ada_b": jnp.zeros((1, 2 * C), jnp.float32),
        # head: Linear(C, V)                  (stored transposed: (C, V))
        "head_w": trunc(ks[2], (C, V), 0.02),
        "head_b": jnp.zeros((1, V), jnp.float32),
        # shared_ada_lin[-1] (SharedAdaLin): Linear(D, 6C) transposed
        "shared_ada_w": trunc(ks[3], (D, 6 * C), 0.02),
        "shared_ada_b": jnp.zeros((1, 6 * C), jnp.float32),
        # positional / level embeddings (constructed for shape fidelity)
        "pos_start": trunc(ks[4], (1, patch_nums[0] ** 2, C), init_std),
        "pos_1LC": trunc(ks[5], (1, sum(p * p for p in patch_nums), C), init_std),
        "lvl_embed": trunc(ks[6], (len(patch_nums), C), init_std),
        # word_embed: Linear(Cvae, C) — Cvae taken = C here (VQVAE not given)
        "word_embed_w": trunc(ks[7], (C, C), 0.02),
        "word_embed_b": jnp.zeros((1, C), jnp.float32),
    }

    # Registered buffers lvl_1L / attn_bias_for_masking (plain-JAX glue).
    L = sum(p * p for p in patch_nums)
    d = jnp.concatenate(
        [jnp.full((p * p,), i, jnp.int32) for i, p in enumerate(patch_nums)]
    ).reshape(1, L, 1)
    dT = jnp.transpose(d, (0, 2, 1))
    buffers = {
        "lvl_1L": dT[:, 0],
        "attn_bias_for_masking": jnp.where(
            d == dT, 0.0, -jnp.inf).reshape(1, 1, L, L).astype(jnp.float32),
    }
    return params, buffers


# ----------------------------------------------------------------------------
# Pure-JAX reference (f32 LayerNorm like the module; x and head weight are
# bf16-quantized at the same points as the kernel so the comparison isolates
# MXU accumulation order).
# ----------------------------------------------------------------------------
def ref_get_logits(h, cond, p):
    C = h.shape[-1]
    silu = cond * jax.nn.sigmoid(cond)
    ada = silu @ p["ada_w"] + p["ada_b"]
    scale, shift = ada[:, :C], ada[:, C:]
    mean = h.mean(-1, keepdims=True)
    var = ((h - mean) ** 2).mean(-1, keepdims=True)
    ln = (h - mean) / jnp.sqrt(var + NORM_EPS)
    x = ln * (scale[:, None, :] + 1.0) + shift[:, None, :]
    xq = x.astype(jnp.bfloat16).astype(jnp.float32)
    wq = p["head_w"].astype(jnp.bfloat16).astype(jnp.float32)
    return xq @ wq + p["head_b"]


if __name__ == "__main__":
    # Small shapes consistent with the module's conventions.
    B = 2
    C = D = 32                      # embed_dim = cond_dim
    V = 256                         # vocab size (lane-dense)
    num_classes = 10
    patch_nums = (1, 2, 3)          # L = 1 + 4 + 9 = 14
    L = sum(p * p for p in patch_nums)

    key = jax.random.PRNGKey(0)
    k_param, k_h, k_lbl = jax.random.split(key, 3)
    params, buffers = build_transformer_params(
        k_param, num_classes=num_classes, C=C, D=D, V=V,
        patch_nums=patch_nums)

    # Example inputs: hidden states h (B, L, C) and class-conditioning cond_BD
    # obtained via the class embedding table (plain-JAX gather = glue).
    h = jax.random.normal(k_h, (B, L, C), jnp.float32)
    labels = jax.random.randint(k_lbl, (B,), 0, num_classes)
    cond_BD = params["class_emb"][labels]                       # (B, D)

    # Pallas kernels (default tiles: full extents at this size).
    logits = get_logits(h, cond_BD, params)                     # (B, L, V)
    gss = shared_ada_lin(cond_BD, params["shared_ada_w"],
                         params["shared_ada_b"])                # (B, 1, 6, C)
    # Also exercise the cdiv / masked-tail path (L=14 split into 8+6 tiles).
    logits_tail = get_logits(h, cond_BD, params, tl=8, tv=128)
    jax.block_until_ready((logits, gss, logits_tail))

    # Correctness checks.
    ref = ref_get_logits(h, cond_BD, params)
    assert logits.shape == (B, L, V) and logits.dtype == jnp.float32
    assert gss.shape == (B, 1, 6, C)
    assert jnp.allclose(logits, ref, atol=2e-2, rtol=2e-2), (
        "get_logits mismatch vs reference: max err = "
        f"{float(jnp.max(jnp.abs(logits - ref)))}")
    assert jnp.allclose(logits_tail, ref, atol=2e-2, rtol=2e-2), (
        "get_logits (masked-tail tiling) mismatch vs reference: max err = "
        f"{float(jnp.max(jnp.abs(logits_tail - ref)))}")

    ref_gss = (cond_BD.astype(jnp.bfloat16).astype(jnp.float32)
               @ params["shared_ada_w"].astype(jnp.bfloat16).astype(jnp.float32)
               + params["shared_ada_b"]).reshape(B, 1, 6, C)
    assert jnp.allclose(gss, ref_gss, atol=2e-2, rtol=2e-2), (
        "shared_ada_lin mismatch vs reference")

    print("KERNEL_OK")
</pallas_src>

<mosaic_0001>
module attributes {stable_mosaic.version = 11 : i64} {
  func.func @_head_kernel(%arg0: i32, %arg1: i32, %arg2: i32, %arg3: memref<1x14x32xf32, #tpu.memory_space<vmem>>, %arg4: memref<1x1x32xf32, #tpu.memory_space<vmem>>, %arg5: memref<1x1x32xf32, #tpu.memory_space<vmem>>, %arg6: memref<32x256xbf16, #tpu.memory_space<vmem>>, %arg7: memref<1x256xf32, #tpu.memory_space<vmem>>, %arg8: memref<1x14x256xf32, #tpu.memory_space<vmem>>, %arg9: memref<14x32xbf16, #tpu.memory_space<vmem>>) attributes {dimension_semantics = [#tpu.dimension_semantics<parallel>, #tpu.dimension_semantics<parallel>, #tpu.dimension_semantics<arbitrary>], iteration_bounds = array<i64: 2, 1, 1>, scalar_prefetch = 0 : i64, scratch_operands = 1 : i64, tpu.core_type = #tpu.core_type<tc>, window_params = [{transform_indices = @transform_0, window_bounds = array<i64: 1, 14, 32>}, {transform_indices = @transform_1, window_bounds = array<i64: 1, 1, 32>}, {transform_indices = @transform_2, window_bounds = array<i64: 1, 1, 32>}, {transform_indices = @transform_3, window_bounds = array<i64: 32, 256>}, {transform_indices = @transform_4, window_bounds = array<i64: 1, 256>}, {transform_indices = @transform_5, window_bounds = array<i64: 1, 14, 256>}]} {
    %c0_i32 = arith.constant 0 : i32
    %0 = arith.cmpi eq, %arg2, %c0_i32 : i32
    %1 = arith.extui %0 : i1 to i32
    %c0_i32_0 = arith.constant 0 : i32
    %2 = arith.cmpi ne, %1, %c0_i32_0 : i32
    scf.if %2 {
      %c0_9 = arith.constant 0 : index
      %c0_10 = arith.constant 0 : index
      %c0_11 = arith.constant 0 : index
      %12 = vector.load %arg3[%c0_9, %c0_10, %c0_11] : memref<1x14x32xf32, #tpu.memory_space<vmem>>, vector<1x14x32xf32>
      %13 = vector.shape_cast %12 : vector<1x14x32xf32> to vector<14x32xf32>
      %cst_12 = arith.constant dense<0.000000e+00> : vector<14xf32>
      %14 = vector.multi_reduction <add>, %13, %cst_12 [1] : vector<14x32xf32> to vector<14xf32>
      %15 = vector.shape_cast %14 : vector<14xf32> to vector<14x1xf32>
      %cst_13 = arith.constant 3.200000e+01 : f32
      %16 = vector.broadcast %cst_13 : f32 to vector<14x1xf32>
      %17 = arith.divf %15, %16 : vector<14x1xf32>
      %18 = vector.broadcast %17 : vector<14x1xf32> to vector<14x32xf32>
      %19 = arith.subf %13, %18 : vector<14x32xf32>
      %20 = arith.mulf %19, %19 : vector<14x32xf32>
      %cst_14 = arith.constant dense<0.000000e+00> : vector<14xf32>
      %21 = vector.multi_reduction <add>, %20, %cst_14 [1] : vector<14x32xf32> to vector<14xf32>
      %22 = vector.shape_cast %21 : vector<14xf32> to vector<14x1xf32>
      %cst_15 = arith.constant 3.200000e+01 : f32
      %23 = vector.broadcast %cst_15 : f32 to vector<14x1xf32>
      %24 = arith.divf %22, %23 : vector<14x1xf32>
      %cst_16 = arith.constant 9.99999997E-7 : f32
      %25 = vector.broadcast %cst_16 : f32 to vector<14x1xf32>
      %26 = arith.addf %24, %25 : vector<14x1xf32>
      %27 = math.rsqrt %26 : vector<14x1xf32>
      %28 = vector.broadcast %27 : vector<14x1xf32> to vector<14x32xf32>
      %29 = arith.mulf %19, %28 : vector<14x32xf32>
      %c0_17 = arith.constant 0 : index
      %c0_18 = arith.constant 0 : index
      %c0_19 = arith.constant 0 : index
      %30 = vector.load %arg4[%c0_17, %c0_18, %c0_19] : memref<1x1x32xf32, #tpu.memory_space<vmem>>, vector<1x1x32xf32>
      %31 = vector.shape_cast %30 : vector<1x1x32xf32> to vector<1x32xf32>
      %32 = vector.broadcast %31 : vector<1x32xf32> to vector<14x32xf32>
      %33 = arith.mulf %29, %32 : vector<14x32xf32>
      %c0_20 = arith.constant 0 : index
      %c0_21 = arith.constant 0 : index
      %c0_22 = arith.constant 0 : index
      %34 = vector.load %arg5[%c0_20, %c0_21, %c0_22] : memref<1x1x32xf32, #tpu.memory_space<vmem>>, vector<1x1x32xf32>
      %35 = vector.shape_cast %34 : vector<1x1x32xf32> to vector<1x32xf32>
      %36 = vector.broadcast %35 : vector<1x32xf32> to vector<14x32xf32>
      %37 = arith.addf %33, %36 : vector<14x32xf32>
      %38 = arith.truncf %37 : vector<14x32xf32> to vector<14x32xbf16>
      %c0_23 = arith.constant 0 : index
      %c0_24 = arith.constant 0 : index
      %39 = vector.load %arg9[%c0_23, %c0_24] : memref<14x32xbf16, #tpu.memory_space<vmem>>, vector<14x32xbf16>
      tpu.vector_store %arg9[%c0_23, %c0_24], %38 {strides = array<i32>} : memref<14x32xbf16, #tpu.memory_space<vmem>>, vector<14x32xbf16>,
    } else {
    }
    %c0 = arith.constant 0 : index
    %c0_1 = arith.constant 0 : index
    %3 = vector.load %arg9[%c0, %c0_1] : memref<14x32xbf16, #tpu.memory_space<vmem>>, vector<14x32xbf16>
    %c0_2 = arith.constant 0 : index
    %c0_3 = arith.constant 0 : index
    %4 = vector.load %arg6[%c0_2, %c0_3] : memref<32x256xbf16, #tpu.memory_space<vmem>>, vector<32x256xbf16>
    %cst = arith.constant dense<0.000000e+00> : vector<14x256xf32>
    %5 = tpu.matmul %3, %4, %cst {dimension_numbers = #tpu.dot_dimension_numbers<[1], [0], [0], [1], [0, 0, 1, 1], [], []>} : vector<14x32xbf16>, vector<32x256xbf16>, vector<14x256xf32> -> vector<14x256xf32>
    %c0_4 = arith.constant 0 : index
    %c0_5 = arith.constant 0 : index
    %6 = vector.load %arg7[%c0_4, %c0_5] : memref<1x256xf32, #tpu.memory_space<vmem>>, vector<1x256xf32>
    %7 = vector.broadcast %6 : vector<1x256xf32> to vector<14x256xf32>
    %8 = arith.addf %5, %7 : vector<14x256xf32>
    %c0_6 = arith.constant 0 : index
    %c0_7 = arith.constant 0 : index
    %c0_8 = arith.constant 0 : index
    %9 = vector.load %arg8[%c0_6, %c0_7, %c0_8] : memref<1x14x256xf32, #tpu.memory_space<vmem>>, vector<1x14x256xf32>
    %10 = vector.shape_cast %9 : vector<1x14x256xf32> to vector<14x256xf32>
    %11 = vector.shape_cast %8 : vector<14x256xf32> to vector<1x14x256xf32>
    tpu.vector_store %arg8[%c0_6, %c0_7, %c0_8], %11 {strides = array<i32>} : memref<1x14x256xf32, #tpu.memory_space<vmem>>, vector<1x14x256xf32>,
    return
  }
  func.func @transform_0(%arg0: i32, %arg1: i32, %arg2: i32) -> (i32, i32, i32) {
    %c0_i32 = arith.constant 0 : i32
    %c0_i32_0 = arith.constant 0 : i32
    return %arg0, %arg1, %c0_i32 : i32, i32, i32
  }
  func.func @transform_1(%arg0: i32, %arg1: i32, %arg2: i32) -> (i32, i32, i32) {
    %c0_i32 = arith.constant 0 : i32
    %c0_i32_0 = arith.constant 0 : i32
    %c0_i32_1 = arith.constant 0 : i32
    return %arg0, %c0_i32, %c0_i32_0 : i32, i32, i32
  }
  func.func @transform_2(%arg0: i32, %arg1: i32, %arg2: i32) -> (i32, i32, i32) {
    %c0_i32 = arith.constant 0 : i32
    %c0_i32_0 = arith.constant 0 : i32
    %c0_i32_1 = arith.constant 0 : i32
    return %arg0, %c0_i32, %c0_i32_0 : i32, i32, i32
  }
  func.func @transform_3(%arg0: i32, %arg1: i32, %arg2: i32) -> (i32, i32) {
    %c0_i32 = arith.constant 0 : i32
    %c0_i32_0 = arith.constant 0 : i32
    return %c0_i32, %arg2 : i32, i32
  }
  func.func @transform_4(%arg0: i32, %arg1: i32, %arg2: i32) -> (i32, i32) {
    %c0_i32 = arith.constant 0 : i32
    %c0_i32_0 = arith.constant 0 : i32
    return %c0_i32, %arg2 : i32, i32
  }
  func.func @transform_5(%arg0: i32, %arg1: i32, %arg2: i32) -> (i32, i32, i32) {
    %c0_i32 = arith.constant 0 : i32
    return %arg0, %arg1, %arg2 : i32, i32, i32
  }
}

</mosaic_0001>

<bundles_post_ra>
// kernel: tpu_custom_call.1
= control target key start
LH: loop header
LB: loop body
LE: loop exit
PB: predicated region body
PF: predicated region fallthrough
CT: control target
= control target key end

     0   :  { %s785_s18 = smov 0   ;;  %s787_s19 = smov 0   ;;  %s848_s0 = inlined_call_operand.vmem [shape: f32[2,14,32], index: 0, kind: input, shape index: {}]   ;;  %s849_s1 = inlined_call_operand.vmem [shape: f32[2,1,32], index: 1, kind: input, shape index: {}]   ;;  %s850_s2 = inlined_call_operand.vmem [shape: f32[2,1,32], index: 2, kind: input, shape index: {}]   ;;  %s851_s3 = inlined_call_operand.vmem [shape: bf16[32,256], index: 3, kind: input, shape index: {}]   ;;  %s852_s4 = inlined_call_operand.vmem [shape: f32[1,256], index: 4, kind: input, shape index: {}]   ;;  %s853_s5 = inlined_call_operand.vmem [shape: f32[2,14,256], index: 5, kind: output, shape index: {}]  }
   0x1   :  { %s789_s20 = smov 0  }
   0x2 LB: > { %s34_s21 = sadd.s32 1, %s748_s19  ;;  %p673_p0 = scmp.ge.s32.totalorder %s752_s20, 1  ;;  %s752_s20 = sphi %s789_s20, %s15_s20   ;;  %s748_s19 = sphi %s787_s19, %s855_s19   ;;  %s744_s18 = sphi %s785_s18, %s854_s18  }
   0x3   : > { %p36_p1 = scmp.ge.s32.totalorder %s34_s21, 2  ;;  %p254_p2 = scmp.lt.s32.totalorder %s752_s20, 3 }
   0x5   : > { %s857_s21 = smov (%p36_p1, %s34_s21), 0  ;;  %p255_p3 = pnand %p673_p0, %p254_p2 }
   0x6   : > { %p311_p4 = scmp.lt.s32.totalorder (!%p255_p3), %s744_s18, 1 }
   0x7   : > { %258 = sbr.rel (%p255_p3) target bundleno = 540 (0x21c), region = 40 }
   0xc   : > { %s859_s18 = smov (!%p311_p4, %s744_s18), 1  ;;  %vm360_vm0 = vcmask 261120   ;;  %vm364_vm1 = vcmask 259072   ;;  %v719_v14 = vld [vmem:[%s851_s3 + $0x14] ss:$8 sps:$4 sm:$0xff]   ;;  %v754_v18 = vmov 0   ;;  %v427_v38 = vlaneseq }
   0xd   : > { %s690_s22 = sshll.u32 %s859_s18, 4  ;;  %v721_v15 = vld [vmem:[%s851_s3 + $0x10] ss:$8 sps:$4 sm:$0xff]   ;;  %v722_v16 = vld [vmem:[%s851_s3 + $0x4] ss:$8 sps:$4 sm:$0xff]   ;;  %478 = vmatprep.subr.bf16.mxu0 %v719_v14  ;;  %498 = vmatprep.mubr.bf16.mxu0 %v754_v18  ;;  %s322_s11 = scalar_lea.vmem %s849_s1, %s859_s18  ;;  %vm415_vm2 = vcmask 257024  }
   0xe   : > { %s318_s25 = scalar_lea.vmem %s848_s0, %s690_s22  ;;  %479 = vmatpush1.bf16.msra.mxu0 %v721_v15  ;;  %v724_v17 = vld [vmem:[%s851_s3] ss:$8 sps:$4 sm:$0xff]   ;;  %s325_s14 = scalar_lea.vmem %s850_s2, %s859_s18  ;;  %vm417_vm3 = vcmask 256000   ;;  %v428_v39 = vshrl.u32 %v427_v38, 7 }
   0xf   : > { %v358_v0 = vld [vmem:[%s318_s25] sm:$0xff]  ;;  %v359_v1 = vld [vmem:[%s318_s25 + $0x8] sm:$0x3f]  ;;  %480 = vmatprep.subr.bf16.mxu0 %v722_v16  ;;  %s691_s17 = sshll.u32 %s859_s18, 5 }
  0x10   : > { %v361_v2 = vsel %vm360_vm0, %v358_v0, 0.0  ;;  %v365_v3 = vsel %vm364_vm1, %v359_v1, 0.0  ;;  %v678_v26 = vld [vmem:[%s322_s11] ss:$0 sm:$0xff]  ;;  %v429_v40 = vsub.s32 0, %v428_v39  ;;  %v433_v42 = vsub.s32 1, %v428_v39  ;;  %s350_s24 = scalar_lea.vmem %s853_s5, %s691_s17 }
  0x11   : > { %362 = vadd.xlane.f32.xlu0 %v361_v2  ;;  %v679_v28 = vld [vmem:[%s325_s14] ss:$0 sm:$0xff] }
  0x12   : > { %481 = vmatpush1.bf16.msra.mxu0 %v724_v17  ;;  %v425_v41 = vld [vmem:[%s852_s4] sm:$0x3] }
  0x13   : > { %v430_v43 = vrot.slane %v425_v41, %v429_v40  ;;  %v434_v44 = vrot.slane %v425_v41, %v433_v42 }
  0x15   : > { %366 = vadd.xlane.f32.xlu0 %v365_v3 }
  0x9a   : > { %v363_v4 = vpop.xlane.xlu0 %362 }
  0x9b   : > { %v369_v5 = vmul.f32 0.03125, %v363_v4 }
  0x9d   : > { %v371_v6 = vsub.f32 %v358_v0, %v369_v5 }
  0x9e   : > { %v367_v7 = vpop.xlane.xlu0 %366 }
  0x9f   : > { %v370_v8 = vmul.f32 0.03125, %v367_v7  ;;  %v373_v9 = vmul.f32 %v371_v6, %v371_v6 }
  0xa1   : > { %v372_v10 = vsub.f32 %v359_v1, %v370_v8  ;;  %v375_v11 = vsel %vm360_vm0, %v373_v9, 0.0 }
  0xa2   : > { %376 = vadd.xlane.f32.xlu1 %v375_v11 }
  0xa3   : > { %v374_v12 = vmul.f32 %v372_v10, %v372_v10 }
  0xa5   : > { %v378_v13 = vsel %vm364_vm1, %v374_v12, 0.0 }
  0xa6   : > { %379 = vadd.xlane.f32.xlu1 %v378_v13 }
 0x12b   : > { %v377_v19 = vpop.xlane.xlu1 %376 }
 0x12c   : > { %v381_v20 = vmul.f32 0.03125, %v377_v19 }
 0x12e   : > { %v383_v21 = vadd.f32 1e-06, %v381_v20 }
 0x12f   : > { %v380_v22 = vpop.xlane.xlu1 %379 }
 0x130   : > { %726 = vrsqrt.f32 %v383_v21  ;;  %v382_v23 = vmul.f32 0.03125, %v380_v22 }
 0x132   : > { %v384_v24 = vadd.f32 1e-06, %v382_v23 }
 0x134   : > { %728 = vrsqrt.f32 %v384_v24 }
 0x13d   : > { %v727_v25 = vpop.eup %726 }
 0x13e   : > { %v387_v27 = vmul.f32 %v727_v25, %v371_v6 }
 0x140   : > { %v396_v29 = vmul.f32 %v678_v26, %v387_v27 }
 0x141   : > { %v729_v30 = vpop.eup %728 }
 0x142   : > { %v405_v31 = vadd.f32 %v679_v28, %v396_v29  ;;  %v388_v32 = vmul.f32 %v729_v30, %v372_v10 }
 0x144   : > { %v692_v33 = vpack.c.bf16 %v405_v31, %v405_v31  ;;  %v397_v34 = vmul.f32 %v678_v26, %v388_v32 }
 0x146   : > { %416 = vst.msk [vmem:[#allocation2] sm:$0xf] %vm415_vm2, %v692_v33  ;;  %v406_v35 = vadd.f32 %v679_v28, %v397_v34 }
 0x148   : > { %v693_v36 = vpack.c.bf16 %v406_v35, %v406_v35 }
 0x14a   : > { %418 = vst.msk [vmem:[#allocation2 + $0x4] sm:$0x7] %vm417_vm3, %v693_v36 }
 0x151   : > { %v725_v37 = vld [vmem:[#allocation2] sm:$0x7f]  }
 0x152   : > { %687 = vmatmul.mubr.msk.bf16.vlgmr.msra.gmra.mxu0 %vm360_vm0, %v725_v37 }
 0x212   : > { %v500_v45 = vpop.f32.mrf.mxu0 }
 0x213   : > { %v501_v46 = vadd.f32 %v500_v45, %v430_v43 }
 0x214   : > { %v502_v47 = vpop.f32.mrf.mxu0 }
 0x215   : > { %509 = vst [vmem:[%s350_s24] sm:$0xff] %v501_v46  ;;  %v503_v48 = vadd.f32 %v502_v47, %v434_v44 }
 0x216   : > { %v504_v49 = vpop.f32.mrf.mxu0 }
 0x217   : > { %510 = vst [vmem:[%s350_s24 + $0x8] sm:$0xff] %v503_v48  ;;  %v505_v50 = vadd.f32 %v504_v49, %v430_v43 }
 0x218   : > { %v506_v51 = vpop.f32.mrf.mxu0 }
 0x219   : > { %511 = vst [vmem:[%s350_s24 + $0x10] sm:$0x3f] %v505_v50  ;;  %v507_v52 = vadd.f32 %v506_v51, %v434_v44 }
 0x21b   : > { %512 = vst [vmem:[%s350_s24 + $0x18] sm:$0x3f] %v507_v52 }
 0x21c PF: > { %s15_s20 = sadd.s32 1, %s752_s20   ;;  %s854_s18 = smov %s748_s19 }
 0x21d   : > { %p12_p5 = scmp.ge.s32.totalorder %s15_s20, 4   ;;  %s855_s19 = smov %s857_s21 }
 0x21f   :  { %14 = sbr.rel (!%p12_p5) target bundleno = 2 (0x2), region = 86 }

</bundles_post_ra>
